<compile_context>
chip_gen: v6e
topology: v6e:2x2x1
jax: 0.10.0
libtpu: 0.0.40
codegen_flags: <defaults>
</compile_context>

<pallas_src>
import functools

import jax
import jax.numpy as jnp
from jax.experimental import pallas as pl
from jax.experimental.pallas import tpu as pltpu


def _round_up(x, m):
    return (x + m - 1) // m * m


def _clssimp_kernel(x_ref, w_ref, b_ref, o_ref, acc_ref, *, inv_hw):
    """One grid step.

    x_ref  : (tile_b, tile_hw, C)  activation tile, C lane-dense
    w_ref  : (C, NC_pad)           VMEM-resident across the whole grid
    b_ref  : (1, NC_pad)           VMEM-resident across the whole grid
    o_ref  : (tile_b, NC_pad)      output tile (resident across the HW axis)
    acc_ref: (tile_b, C) f32       running spatial sum
    """
    k = pl.program_id(1)

    @pl.when(k == 0)
    def _init():
        acc_ref[...] = jnp.zeros_like(acc_ref)

    # Spatial partial sum in f32.  Reduction runs over the sublane (HW) axis;
    # C stays on lanes, so this is plain VALU adds hidden under the x DMA.
    acc_ref[...] += jnp.sum(x_ref[...].astype(jnp.float32), axis=1)

    @pl.when(k == pl.num_programs(1) - 1)
    def _finalize():
        # MXU matmul with f32 accumulation (jnp promotes bf16 weights).
        logits = jnp.dot(acc_ref[...], w_ref[...],
                         preferred_element_type=jnp.float32)
        # mean = sum * 1/(H*W); applied post-matmul and fused with the bias.
        logits = logits * inv_hw + b_ref[...].astype(jnp.float32)
        o_ref[...] = logits.astype(o_ref.dtype)


def clssimp_forward(x_nchw, weight, bias, *, tile_b=None, tile_hw=None):
    """Equivalent of clssimp.forward.

    x_nchw: (B, C, H, W); weight: (num_classes, C); bias: (num_classes,).
    Returns logits of shape (B, num_classes) in x's dtype.
    """
    B, C, H, W = x_nchw.shape
    HW = H * W
    NC = weight.shape[0]
    itemsize = jnp.dtype(x_nchw.dtype).itemsize

    # Layout glue: channels-last so C is lane-dense inside the kernel.
    # TODO(synk): accept NHWC activations upstream and drop this extra pass.
    x = jnp.transpose(x_nchw, (0, 2, 3, 1)).reshape(B, HW, C)

    # ---- batch tile: avoid padding x (a full HBM copy) whenever possible ----
    if tile_b is None:
        if B % 8 == 0:
            tile_b = 8           # 8 sublanes per f32 vreg, no padding needed
        elif B <= 64:
            tile_b = B           # full-batch block == full dim, no padding
        else:
            tile_b = 8           # rare: large ragged batch -> pad below

    # ---- HW tile: biggest that fits ~3 MiB; prefer no-pad choices ----
    budget = 3 * 1024 * 1024
    per_row = max(1, tile_b * C * itemsize)
    if tile_hw is None:
        if HW * per_row <= budget:
            tile_hw = HW         # single reduction step, full dim, no padding
        else:
            t = max(8, (budget // per_row) // 8 * 8)
            tile_hw = t
            for cand in range(t, 7, -8):      # prefer a divisor of HW
                if HW % cand == 0:
                    tile_hw = cand
                    break

    B_pad = _round_up(B, tile_b)
    HW_pad = _round_up(HW, tile_hw)
    NC_pad = _round_up(NC, 128)  # full MXU tile + unmasked lane-dense store

    if (B_pad, HW_pad) != (B, HW):
        # Zero padding is exact: zeros don't change the spatial sum and we
        # divide by the true H*W.  Default tile choices avoid this copy.
        x = jnp.pad(x, ((0, B_pad - B), (0, HW_pad - HW), (0, 0)))

    # Pre-transposed, NC-padded weight / bias (tiny, one-time layout glue).
    # TODO(synk): in a real model, store the weight pre-transposed/padded once.
    w_t = jnp.zeros((C, NC_pad), weight.dtype).at[:, :NC].set(weight.T)
    b_p = jnp.zeros((1, NC_pad), bias.dtype).at[:, :NC].set(bias[None, :])

    grid = (B_pad // tile_b, HW_pad // tile_hw)
    kernel = functools.partial(_clssimp_kernel, inv_hw=float(1.0 / HW))

    cost = pl.CostEstimate(
        flops=2 * B_pad * C * NC_pad + B_pad * HW_pad * C,
        transcendentals=0,
        bytes_accessed=(x.size * itemsize
                        + w_t.size * w_t.dtype.itemsize
                        + b_p.size * b_p.dtype.itemsize
                        + B_pad * NC_pad * itemsize),
    )

    out = pl.pallas_call(
        kernel,
        out_shape=jax.ShapeDtypeStruct((B_pad, NC_pad), x_nchw.dtype),
        grid_spec=pltpu.PrefetchScalarGridSpec(
            num_scalar_prefetch=0,
            grid=grid,
            in_specs=[
                # x tile marches over (batch, HW); HW (reduction) axis last.
                pl.BlockSpec((tile_b, tile_hw, C), lambda i, k: (i, k, 0)),
                # weight / bias stay resident in VMEM for the whole grid.
                pl.BlockSpec((C, NC_pad), lambda i, k: (0, 0)),
                pl.BlockSpec((1, NC_pad), lambda i, k: (0, 0)),
            ],
            out_specs=pl.BlockSpec((tile_b, NC_pad), lambda i, k: (i, 0)),
            scratch_shapes=[pltpu.VMEM((tile_b, C), jnp.float32)],
        ),
        compiler_params=pltpu.CompilerParams(
            dimension_semantics=("parallel", "arbitrary")),
        cost_estimate=cost,
    )(x, w_t, b_p)

    return out[:B, :NC]


if __name__ == "__main__":
    # Small shapes consistent with the module's forward (NCHW input, ch -> classes).
    B, C, H, W = 2, 32, 16, 16
    num_classes = 20

    key = jax.random.PRNGKey(0)
    kx, kw, kb = jax.random.split(key, 3)
    x = jax.random.normal(kx, (B, C, H, W), dtype=jnp.float32)
    # Deterministic synthetic parameters (shapes match nn.Linear(ch, num_classes)).
    weight = jax.random.normal(kw, (num_classes, C), dtype=jnp.float32) * 0.02
    bias = jax.random.normal(kb, (num_classes,), dtype=jnp.float32) * 0.01

    # Reference in plain JAX (same math as the PyTorch module).
    ref = jnp.mean(x, axis=(2, 3)) @ weight.T + bias

    # Default tiling: single HW step (pool + matmul fused in one grid step).
    logits = clssimp_forward(x, weight, bias)
    jax.block_until_ready(logits)
    assert logits.shape == (B, num_classes)
    assert jnp.allclose(logits, ref, atol=1e-4, rtol=1e-4)

    # Forced tile_hw=64: 4-step HW reduction exercises the accumulator /
    # pl.when init-finalize path.
    logits2 = clssimp_forward(x, weight, bias, tile_hw=64)
    jax.block_until_ready(logits2)
    assert jnp.allclose(logits2, ref, atol=1e-4, rtol=1e-4)

    print("KERNEL_OK")
</pallas_src>

<mosaic_0001>
module attributes {stable_mosaic.version = 11 : i64} {
  func.func @_clssimp_kernel(%arg0: i32, %arg1: i32, %arg2: memref<2x256x32xf32, #tpu.memory_space<vmem>>, %arg3: memref<32x128xf32, #tpu.memory_space<vmem>>, %arg4: memref<1x128xf32, #tpu.memory_space<vmem>>, %arg5: memref<2x128xf32, #tpu.memory_space<vmem>>, %arg6: memref<2x32xf32, #tpu.memory_space<vmem>>) attributes {dimension_semantics = [#tpu.dimension_semantics<parallel>, #tpu.dimension_semantics<arbitrary>], iteration_bounds = array<i64: 1, 1>, scalar_prefetch = 0 : i64, scratch_operands = 1 : i64, tpu.core_type = #tpu.core_type<tc>, window_params = [{transform_indices = @transform_0, window_bounds = array<i64: 2, 256, 32>}, {pipeline_mode = #tpu.pipeline_mode<synchronous>, transform_indices = @transform_1, window_bounds = array<i64: 32, 128>}, {pipeline_mode = #tpu.pipeline_mode<synchronous>, transform_indices = @transform_2, window_bounds = array<i64: 1, 128>}, {transform_indices = @transform_3, window_bounds = array<i64: 2, 128>}]} {
    %c0_i32 = arith.constant 0 : i32
    %0 = arith.cmpi eq, %arg1, %c0_i32 : i32
    %1 = arith.extui %0 : i1 to i32
    %c0_i32_0 = arith.constant 0 : i32
    %2 = arith.cmpi ne, %1, %c0_i32_0 : i32
    scf.if %2 {
      %cst_9 = arith.constant 0.000000e+00 : f32
      %11 = vector.broadcast %cst_9 : f32 to vector<2x32xf32>
      %c0_10 = arith.constant 0 : index
      %c0_11 = arith.constant 0 : index
      %12 = vector.load %arg6[%c0_10, %c0_11] : memref<2x32xf32, #tpu.memory_space<vmem>>, vector<2x32xf32>
      tpu.vector_store %arg6[%c0_10, %c0_11], %11 {strides = array<i32>} : memref<2x32xf32, #tpu.memory_space<vmem>>, vector<2x32xf32>,
    } else {
    }
    %c0 = arith.constant 0 : index
    %c0_1 = arith.constant 0 : index
    %3 = vector.load %arg6[%c0, %c0_1] : memref<2x32xf32, #tpu.memory_space<vmem>>, vector<2x32xf32>
    %c0_2 = arith.constant 0 : index
    %c0_3 = arith.constant 0 : index
    %c0_4 = arith.constant 0 : index
    %4 = vector.load %arg2[%c0_2, %c0_3, %c0_4] : memref<2x256x32xf32, #tpu.memory_space<vmem>>, vector<2x256x32xf32>
    %cst = arith.constant dense<0.000000e+00> : vector<2x32xf32>
    %5 = vector.multi_reduction <add>, %4, %cst [1] : vector<2x256x32xf32> to vector<2x32xf32>
    %6 = arith.addf %3, %5 : vector<2x32xf32>
    %c0_5 = arith.constant 0 : index
    %c0_6 = arith.constant 0 : index
    %7 = vector.load %arg6[%c0_5, %c0_6] : memref<2x32xf32, #tpu.memory_space<vmem>>, vector<2x32xf32>
    tpu.vector_store %arg6[%c0_5, %c0_6], %6 {strides = array<i32>} : memref<2x32xf32, #tpu.memory_space<vmem>>, vector<2x32xf32>,
    %c0_i32_7 = arith.constant 0 : i32
    %8 = arith.cmpi eq, %arg1, %c0_i32_7 : i32
    %9 = arith.extui %8 : i1 to i32
    %c0_i32_8 = arith.constant 0 : i32
    %10 = arith.cmpi ne, %9, %c0_i32_8 : i32
    scf.if %10 {
      %c0_9 = arith.constant 0 : index
      %c0_10 = arith.constant 0 : index
      %11 = vector.load %arg6[%c0_9, %c0_10] : memref<2x32xf32, #tpu.memory_space<vmem>>, vector<2x32xf32>
      %c0_11 = arith.constant 0 : index
      %c0_12 = arith.constant 0 : index
      %12 = vector.load %arg3[%c0_11, %c0_12] : memref<32x128xf32, #tpu.memory_space<vmem>>, vector<32x128xf32>
      %cst_13 = arith.constant dense<0.000000e+00> : vector<2x128xf32>
      %13 = tpu.matmul %11, %12, %cst_13 {dimension_numbers = #tpu.dot_dimension_numbers<[1], [0], [0], [1], [0, 0, 1, 1], [], []>} : vector<2x32xf32>, vector<32x128xf32>, vector<2x128xf32> -> vector<2x128xf32>
      %cst_14 = arith.constant 3.906250e-03 : f32
      %14 = vector.broadcast %cst_14 : f32 to vector<2x128xf32>
      %15 = arith.mulf %13, %14 : vector<2x128xf32>
      %c0_15 = arith.constant 0 : index
      %c0_16 = arith.constant 0 : index
      %16 = vector.load %arg4[%c0_15, %c0_16] : memref<1x128xf32, #tpu.memory_space<vmem>>, vector<1x128xf32>
      %17 = vector.broadcast %16 : vector<1x128xf32> to vector<2x128xf32>
      %18 = arith.addf %15, %17 : vector<2x128xf32>
      %c0_17 = arith.constant 0 : index
      %c0_18 = arith.constant 0 : index
      %19 = vector.load %arg5[%c0_17, %c0_18] : memref<2x128xf32, #tpu.memory_space<vmem>>, vector<2x128xf32>
      tpu.vector_store %arg5[%c0_17, %c0_18], %18 {strides = array<i32>} : memref<2x128xf32, #tpu.memory_space<vmem>>, vector<2x128xf32>,
    } else {
    }
    return
  }
  func.func @transform_0(%arg0: i32, %arg1: i32) -> (i32, i32, i32) {
    %c0_i32 = arith.constant 0 : i32
    %c0_i32_0 = arith.constant 0 : i32
    return %arg0, %arg1, %c0_i32 : i32, i32, i32
  }
  func.func @transform_1(%arg0: i32, %arg1: i32) -> (i32, i32) {
    %c0_i32 = arith.constant 0 : i32
    %c0_i32_0 = arith.constant 0 : i32
    %c0_i32_1 = arith.constant 0 : i32
    return %c0_i32, %c0_i32_0 : i32, i32
  }
  func.func @transform_2(%arg0: i32, %arg1: i32) -> (i32, i32) {
    %c0_i32 = arith.constant 0 : i32
    %c0_i32_0 = arith.constant 0 : i32
    %c0_i32_1 = arith.constant 0 : i32
    return %c0_i32, %c0_i32_0 : i32, i32
  }
  func.func @transform_3(%arg0: i32, %arg1: i32) -> (i32, i32) {
    %c0_i32 = arith.constant 0 : i32
    %c0_i32_0 = arith.constant 0 : i32
    return %arg0, %c0_i32 : i32, i32
  }
}

</mosaic_0001>

<bundles_post_ra>
// kernel: tpu_custom_call.1
= control target key start
LH: loop header
LB: loop body
LE: loop exit
PB: predicated region body
PF: predicated region fallthrough
CT: control target
= control target key end

     0   :  { %vm19_vm0 = vcmask 254976   ;;  %vm86_vm1 = vcmask 261120   ;;  %v381_v3 = vmov 0.0   ;;  %s687_s0 = inlined_call_operand.vmem [shape: f32[2,256,32], index: 0, kind: input, shape index: {}]   ;;  %s688_s1 = inlined_call_operand.vmem [shape: f32[32,128], index: 1, kind: input, shape index: {}]   ;;  %s689_s2 = inlined_call_operand.vmem [shape: f32[1,128], index: 2, kind: input, shape index: {}]   ;;  %s690_s3 = inlined_call_operand.hbm [shape: f32[2,128], index: 3, kind: output, shape index: {}]  }
   0x1   :  { %v22_v0 = vld [vmem:[%s687_s0] sm:$0xff]  ;;  %v23_v1 = vld [vmem:[%s687_s0 + $0x8] sm:$0xff]  ;;  %v24_v2 = vld [vmem:[%s687_s0 + $0x10] sm:$0xff]  ;;  %20 = vst.msk [vmem:[#allocation2] sm:$0x3] %vm19_vm0, %v381_v3  ;;  %345 = vmatprep.subr.mxu0 %v381_v3 }
   0x2   :  { %v25_v4 = vld [vmem:[%s687_s0 + $0x18] sm:$0xff]  ;;  %v87_v5 = vsel %vm86_vm1, %v22_v0, 0.0  ;;  %v88_v6 = vsel %vm86_vm1, %v23_v1, 0.0  ;;  %v90_v7 = vsel %vm86_vm1, %v24_v2, 0.0  ;;  %v26_v8 = vld [vmem:[%s687_s0 + $0x20] sm:$0xff]  ;;  %v27_v11 = vld [vmem:[%s687_s0 + $0x28] sm:$0xff] }
   0x3   :  { %v89_v9 = vadd.f32 %v88_v6, %v87_v5  ;;  %v92_v10 = vsel %vm86_vm1, %v25_v4, 0.0  ;;  %v94_v13 = vsel %vm86_vm1, %v26_v8, 0.0  ;;  %v28_v14 = vld [vmem:[%s687_s0 + $0x30] sm:$0xff]  ;;  %v96_v16 = vsel %vm86_vm1, %v27_v11, 0.0  ;;  %v29_v17 = vld [vmem:[%s687_s0 + $0x38] sm:$0xff]  ;;  %v30_v20 = vld [vmem:[%s687_s0 + $0x40] sm:$0xff] }
   0x4   :  { %v98_v19 = vsel %vm86_vm1, %v28_v14, 0.0  ;;  %v54_v22 = vld [vmem:[%s687_s0 + $0x100] sm:$0xff]  ;;  %v55_v23 = vld [vmem:[%s687_s0 + $0x108] sm:$0xff]  ;;  %v56_v24 = vld [vmem:[%s687_s0 + $0x110] sm:$0xff]  ;;  %v100_v25 = vsel %vm86_vm1, %v29_v17, 0.0  ;;  %v102_v33 = vsel %vm86_vm1, %v30_v20, 0.0 }
   0x5   :  { %v91_v12 = vadd.f32 %v90_v7, %v89_v9  ;;  %v31_v26 = vld [vmem:[%s687_s0 + $0x48] sm:$0xff]  ;;  %v57_v27 = vld [vmem:[%s687_s0 + $0x118] sm:$0xff]  ;;  %v156_v29 = vsel %vm86_vm1, %v54_v22, 0.0  ;;  %v157_v30 = vsel %vm86_vm1, %v55_v23, 0.0  ;;  %v159_v31 = vsel %vm86_vm1, %v56_v24, 0.0  ;;  %v58_v32 = vld [vmem:[%s687_s0 + $0x120] sm:$0xff] }
   0x6   :  { %v158_v34 = vadd.f32 %v157_v30, %v156_v29  ;;  %v32_v35 = vld [vmem:[%s687_s0 + $0x50] sm:$0xff]  ;;  %v161_v37 = vsel %vm86_vm1, %v57_v27, 0.0  ;;  %v59_v38 = vld [vmem:[%s687_s0 + $0x128] sm:$0xff]  ;;  %v104_v39 = vsel %vm86_vm1, %v31_v26, 0.0  ;;  %v33_v41 = vld [vmem:[%s687_s0 + $0x58] sm:$0xff]  ;;  %v163_v43 = vsel %vm86_vm1, %v58_v32, 0.0 }
   0x7   :  { %v93_v15 = vadd.f32 %v92_v10, %v91_v12  ;;  %v60_v44 = vld [vmem:[%s687_s0 + $0x130] sm:$0xff]  ;;  %v106_v45 = vsel %vm86_vm1, %v32_v35, 0.0  ;;  %v34_v47 = vld [vmem:[%s687_s0 + $0x60] sm:$0xff]  ;;  %v165_v49 = vsel %vm86_vm1, %v59_v38, 0.0  ;;  %v61_v50 = vld [vmem:[%s687_s0 + $0x138] sm:$0xff]  ;;  %v108_v51 = vsel %vm86_vm1, %v33_v41, 0.0 }
   0x8   :  { %v160_v40 = vadd.f32 %v159_v31, %v158_v34  ;;  %v35_v53 = vld [vmem:[%s687_s0 + $0x68] sm:$0xff]  ;;  %v167_v55 = vsel %vm86_vm1, %v60_v44, 0.0  ;;  %v62_v56 = vld [vmem:[%s687_s0 + $0x140] sm:$0xff]  ;;  %v110_v57 = vsel %vm86_vm1, %v34_v47, 0.0  ;;  %v240_v59 = vld [vmem:[%s688_s1 + $0x18] sm:$0xff]  ;;  %v169_v62 = vsel %vm86_vm1, %v61_v50, 0.0 }
   0x9   :  { %v95_v18 = vadd.f32 %v94_v13, %v93_v15  ;;  %v36_v60 = vld [vmem:[%s687_s0 + $0x70] sm:$0xff]  ;;  %346 = vmatpush3.msra.mxu0 %v240_v59  ;;  %v63_v0 = vld [vmem:[%s687_s0 + $0x148] sm:$0xff]  ;;  %v112_v1 = vsel %vm86_vm1, %v35_v53, 0.0 }
   0xa   :  { %v162_v46 = vadd.f32 %v161_v37, %v160_v40  ;;  %v239_v63 = vld [vmem:[%s688_s1 + $0x10] sm:$0xff]  ;;  %347 = vmatprep.subr.mxu0 %v381_v3  ;;  %v238_v4 = vld [vmem:[%s688_s1 + $0x8] sm:$0xff] }
   0xb   :  { %v97_v21 = vadd.f32 %v96_v16, %v95_v18 }
   0xc   :  { %v164_v52 = vadd.f32 %v163_v43, %v162_v46 }
   0xd   :  { %v99_v28 = vadd.f32 %v98_v19, %v97_v21 }
   0xe   :  { %v166_v58 = vadd.f32 %v165_v49, %v164_v52 }
   0xf   :  { %v101_v36 = vadd.f32 %v100_v25, %v99_v28 }
  0x10   :  { %v168_v2 = vadd.f32 %v167_v55, %v166_v58 }
  0x11   :  { %v103_v42 = vadd.f32 %v102_v33, %v101_v36 }
  0x13   :  { %v105_v48 = vadd.f32 %v104_v39, %v103_v42 }
  0x15   :  { %v107_v54 = vadd.f32 %v106_v45, %v105_v48 }
  0x17   :  { %v109_v61 = vadd.f32 %v108_v51, %v107_v54 }
  0x18   :  { %8 = vsyncpa [#allocation4], 0  ;;  %v37_v5 = vld [vmem:[%s687_s0 + $0x78] sm:$0xff]  ;;  %v171_v7 = vsel %vm86_vm1, %v62_v56, 0.0  ;;  %348 = vmatpush3.msra.mxu0 %v239_v63  ;;  %vm382_vm2 = vmmov 0   ;;  %v64_v8 = vld [vmem:[%s687_s0 + $0x150] sm:$0xff]  ;;  %v170_v10 = vadd.f32 %v169_v62, %v168_v2 }
  0x19   :  { %v111_v6 = vadd.f32 %v110_v57, %v109_v61  ;;  %353 = vmatprep.mubr.msk.f32.mxu0 %vm382_vm2, %v381_v3  ;;  %v114_v9 = vsel %vm86_vm1, %v36_v60, 0.0  ;;  %349 = vmatprep.subr.mxu0 %v381_v3  ;;  %v237_v11 = vld [vmem:[%s688_s1] sm:$0xff]  ;;  %v173_v14 = vsel %vm86_vm1, %v63_v0, 0.0  ;;  %v65_v15 = vld [vmem:[%s687_s0 + $0x158] sm:$0xff]  ;;  %v116_v16 = vsel %vm86_vm1, %v37_v5, 0.0  ;;  %v39_v18 = vld [vmem:[%s687_s0 + $0x88] sm:$0xff] }
  0x1a   :  { %v38_v12 = vld [vmem:[%s687_s0 + $0x80] sm:$0xff]  ;;  %350 = vmatpush3.msra.mxu0 %v238_v4  ;;  %v172_v17 = vadd.f32 %v171_v7, %v170_v10  ;;  %v175_v20 = vsel %vm86_vm1, %v64_v8, 0.0  ;;  %v40_v24 = vld [vmem:[%s687_s0 + $0x90] sm:$0xff]  ;;  %v177_v25 = vsel %vm86_vm1, %v65_v15, 0.0  ;;  %v67_v26 = vld [vmem:[%s687_s0 + $0x168] sm:$0xff]  ;;  %v120_v27 = vsel %vm86_vm1, %v39_v18, 0.0 }
  0x1b   :  { %v113_v13 = vadd.f32 %v112_v1, %v111_v6  ;;  %351 = vmatprep.subr.mxu0 %v381_v3  ;;  %v66_v21 = vld [vmem:[%s687_s0 + $0x160] sm:$0xff]  ;;  %v118_v22 = vsel %vm86_vm1, %v38_v12, 0.0  ;;  %v41_v29 = vld [vmem:[%s687_s0 + $0x98] sm:$0xff]  ;;  %v68_v32 = vld [vmem:[%s687_s0 + $0x170] sm:$0xff]  ;;  %v122_v33 = vsel %vm86_vm1, %v40_v24, 0.0  ;;  %v181_v37 = vsel %vm86_vm1, %v67_v26, 0.0 }
  0x1c   :  { %352 = vmatpush3.msra.mxu0 %v237_v11  ;;  %v174_v23 = vadd.f32 %v173_v14, %v172_v17  ;;  %v179_v31 = vsel %vm86_vm1, %v66_v21, 0.0  ;;  %v42_v35 = vld [vmem:[%s687_s0 + $0xa0] sm:$0xff]  ;;  %v69_v38 = vld [vmem:[%s687_s0 + $0x178] sm:$0xff]  ;;  %v124_v39 = vsel %vm86_vm1, %v41_v29, 0.0  ;;  %v43_v41 = vld [vmem:[%s687_s0 + $0xa8] sm:$0xff]  ;;  %v183_v43 = vsel %vm86_vm1, %v68_v32, 0.0 }
  0x1d   :  { %v115_v19 = vadd.f32 %v114_v9, %v113_v13  ;;  %v70_v44 = vld [vmem:[%s687_s0 + $0x180] sm:$0xff]  ;;  %v126_v45 = vsel %vm86_vm1, %v42_v35, 0.0  ;;  %v44_v47 = vld [vmem:[%s687_s0 + $0xb0] sm:$0xff]  ;;  %v185_v49 = vsel %vm86_vm1, %v69_v38, 0.0  ;;  %v71_v50 = vld [vmem:[%s687_s0 + $0x188] sm:$0xff]  ;;  %v128_v51 = vsel %vm86_vm1, %v43_v41, 0.0 }
  0x1e   :  { %v176_v28 = vadd.f32 %v175_v20, %v174_v23  ;;  %v45_v53 = vld [vmem:[%s687_s0 + $0xb8] sm:$0xff]  ;;  %v187_v55 = vsel %vm86_vm1, %v70_v44, 0.0  ;;  %v72_v56 = vld [vmem:[%s687_s0 + $0x190] sm:$0xff]  ;;  %v130_v57 = vsel %vm86_vm1, %v44_v47, 0.0  ;;  %v46_v59 = vld [vmem:[%s687_s0 + $0xc0] sm:$0xff]  ;;  %v189_v61 = vsel %vm86_vm1, %v71_v50, 0.0 }
  0x1f   :  { %v117_v3 = vadd.f32 %v116_v16, %v115_v19  ;;  %v73_v62 = vld [vmem:[%s687_s0 + $0x198] sm:$0xff]  ;;  %v132_v63 = vsel %vm86_vm1, %v45_v53, 0.0  ;;  %v47_v1 = vld [vmem:[%s687_s0 + $0xc8] sm:$0xff]  ;;  %v191_v4 = vsel %vm86_vm1, %v72_v56, 0.0  ;;  %v74_v5 = vld [vmem:[%s687_s0 + $0x1a0] sm:$0xff]  ;;  %v134_v6 = vsel %vm86_vm1, %v46_v59, 0.0 }
  0x20   :  { %v178_v34 = vadd.f32 %v177_v25, %v176_v28  ;;  %v48_v8 = vld [vmem:[%s687_s0 + $0xd0] sm:$0xff]  ;;  %v193_v10 = vsel %vm86_vm1, %v73_v62, 0.0  ;;  %v75_v11 = vld [vmem:[%s687_s0 + $0x1a8] sm:$0xff]  ;;  %v136_v12 = vsel %vm86_vm1, %v47_v1, 0.0  ;;  %v49_v14 = vld [vmem:[%s687_s0 + $0xd8] sm:$0xff]  ;;  %v195_v16 = vsel %vm86_vm1, %v74_v5, 0.0 }
  0x21   :  { %v119_v30 = vadd.f32 %v118_v22, %v117_v3  ;;  %v76_v17 = vld [vmem:[%s687_s0 + $0x1b0] sm:$0xff]  ;;  %v138_v18 = vsel %vm86_vm1, %v48_v8, 0.0  ;;  %v50_v20 = vld [vmem:[%s687_s0 + $0xe0] sm:$0xff]  ;;  %v197_v22 = vsel %vm86_vm1, %v75_v11, 0.0  ;;  %v77_v23 = vld [vmem:[%s687_s0 + $0x1b8] sm:$0xff]  ;;  %v140_v24 = vsel %vm86_vm1, %v49_v14, 0.0 }
  0x22   :  { %v180_v40 = vadd.f32 %v179_v31, %v178_v34  ;;  %v51_v25 = vld [vmem:[%s687_s0 + $0xe8] sm:$0xff]  ;;  %v78_v28 = vld [vmem:[%s687_s0 + $0x1c0] sm:$0xff]  ;;  %v142_v29 = vsel %vm86_vm1, %v50_v20, 0.0  ;;  %v52_v31 = vld [vmem:[%s687_s0 + $0xf0] sm:$0xff]  ;;  %vm227_vm3 = vcmask 1041409   ;;  %s383_s11 = smov [#allocation3]  }
  0x23   :  { %v121_v36 = vadd.f32 %v120_v27, %v119_v30  ;;  %v199_v27 = vsel %vm86_vm1, %v76_v17, 0.0  ;;  %v79_v34 = vld [vmem:[%s687_s0 + $0x1c8] sm:$0xff]  ;;  %v144_v35 = vsel %vm86_vm1, %v51_v25, 0.0  ;;  %v146_v41 = vsel %vm86_vm1, %v52_v31, 0.0  ;;  %v82_v50 = vld [vmem:[%s687_s0 + $0x1e0] sm:$0xff]  ;;  %s330_s12 = sshll.u32 %s383_s11, 4  ;;  %s331_s12 = int_to_ptr.vmem [resolvable:$true] %s330_s12 }
  0x24   :  { %v182_v46 = vadd.f32 %v181_v37, %v180_v40  ;;  %v53_v37 = vld [vmem:[%s687_s0 + $0xf8] sm:$0xff]  ;;  %v80_v40 = vld [vmem:[%s687_s0 + $0x1d0] sm:$0xff]  ;;  %v205_v44 = vsel %vm86_vm1, %v79_v34, 0.0  ;;  %s359_s13 = scalar_lea.vmem %s331_s12, 32  ;;  %p364_p1 = scmp.lt.s32.totalorder %s331_s12, %s331_s12 }
  0x25   :  { %v123_v42 = vadd.f32 %v122_v33, %v121_v36  ;;  %v201_v33 = vsel %vm86_vm1, %v77_v23, 0.0  ;;  %p360_p0 = scmp.ne.s32.totalorder %s331_s12, %s359_s13  ;;  %p365_p2 = scmp.lt.s32.totalorder %s359_s13, %s359_s13 }
  0x26   :  { %v184_v52 = vadd.f32 %v183_v43, %v182_v46  ;;  %v148_v46 = vsel %vm86_vm1, %v53_v37, 0.0 }
  0x27   :  { %v125_v48 = vadd.f32 %v124_v39, %v123_v42  ;;  %v203_v39 = vsel %vm86_vm1, %v78_v28, 0.0  ;;  %p366_p3 = por %p365_p2, %p364_p1 }
  0x28   :  { %v186_v58 = vadd.f32 %v185_v49, %v184_v52  ;;  %v207_v49 = vsel %vm86_vm1, %v80_v40, 0.0 }
  0x29   :  { %v127_v54 = vadd.f32 %v126_v45, %v125_v48  ;;  %v81_v45 = vld [vmem:[%s687_s0 + $0x1d8] sm:$0xff]  ;;  %p367_p4 = pnand %p366_p3, %p360_p0 }
  0x2a   :  { %v188_v0 = vadd.f32 %v187_v55, %v186_v58  ;;  %v209_v53 = vsel %vm86_vm1, %v81_v45, 0.0  ;;  %v84_v58 = vld [vmem:[%s687_s0 + $0x1f0] sm:$0xff] }
  0x2b   :  { %v129_v60 = vadd.f32 %v128_v51, %v127_v54  ;;  %v83_v54 = vld [vmem:[%s687_s0 + $0x1e8] sm:$0xff] }
  0x2c   :  { %v190_v7 = vadd.f32 %v189_v61, %v188_v0  ;;  %v85_v61 = vld [vmem:[%s687_s0 + $0x1f8] sm:$0xff]  ;;  %v215_v0 = vsel %vm86_vm1, %v84_v58, 0.0 }
  0x2d   :  { %v131_v2 = vadd.f32 %v130_v57, %v129_v60  ;;  %v211_v57 = vsel %vm86_vm1, %v82_v50, 0.0  ;;  %v213_v60 = vsel %vm86_vm1, %v83_v54, 0.0 }
  0x2e   :  { %v192_v13 = vadd.f32 %v191_v4, %v190_v7 }
  0x2f   :  { %v133_v9 = vadd.f32 %v132_v63, %v131_v2  ;;  %v217_v2 = vsel %vm86_vm1, %v85_v61, 0.0 }
  0x30   :  { %v194_v19 = vadd.f32 %v193_v10, %v192_v13 }
  0x31   :  { %v135_v15 = vadd.f32 %v134_v6, %v133_v9 }
  0x32   :  { %v196_v3 = vadd.f32 %v195_v16, %v194_v19 }
  0x33   :  { %v137_v21 = vadd.f32 %v136_v12, %v135_v15  ;;  %v21_v15 = vld [vmem:[#allocation2] sm:$0x3] }
  0x34   :  { %v198_v30 = vadd.f32 %v197_v22, %v196_v3 }
  0x35   :  { %v139_v26 = vadd.f32 %v138_v18, %v137_v21  ;;  %v339_v21 = vld [vmem:[%s689_s2] ss:$0 sm:$0xff] }
  0x36   :  { %v200_v36 = vadd.f32 %v199_v27, %v198_v30 }
  0x37   :  { %v141_v32 = vadd.f32 %v140_v24, %v139_v26 }
  0x38   :  { %v202_v42 = vadd.f32 %v201_v33, %v200_v36 }
  0x39   :  { %v143_v38 = vadd.f32 %v142_v29, %v141_v32 }
  0x3a   :  { %v204_v47 = vadd.f32 %v203_v39, %v202_v42 }
  0x3b   :  { %v145_v43 = vadd.f32 %v144_v35, %v143_v38 }
  0x3c   :  { %v206_v51 = vadd.f32 %v205_v44, %v204_v47 }
  0x3d   :  { %v147_v48 = vadd.f32 %v146_v41, %v145_v43 }
  0x3e   :  { %v208_v55 = vadd.f32 %v207_v49, %v206_v51 }
  0x3f   :  { %v149_v52 = vadd.f32 %v148_v46, %v147_v48 }
  0x40   :  { %v210_v59 = vadd.f32 %v209_v53, %v208_v55 }
  0x41   :  { %v150_v56 = vrot.slane %v149_v52, 4 }
  0x42   :  { %v212_v63 = vadd.f32 %v211_v57, %v210_v59 }
  0x43   :  { %v151_v62 = vadd.f32 %v150_v56, %v149_v52 }
  0x44   :  { %v214_v1 = vadd.f32 %v213_v60, %v212_v63 }
  0x45   :  { %v152_v4 = vrot.slane %v151_v62, 2 }
  0x46   :  { %v216_v5 = vadd.f32 %v215_v0, %v214_v1 }
  0x47   :  { %v153_v7 = vadd.f32 %v152_v4, %v151_v62 }
  0x48   :  { %v218_v6 = vadd.f32 %v217_v2, %v216_v5 }
  0x49   :  { %v154_v10 = vrot.slane %v153_v7, 1 }
  0x4a   :  { %v219_v8 = vrot.slane %v218_v6, 4 }
  0x4b   :  { %v155_v13 = vadd.f32 %v154_v10, %v153_v7 }
  0x4c   :  { %v220_v9 = vadd.f32 %v219_v8, %v218_v6 }
  0x4e   :  { %v221_v11 = vrot.slane %v220_v9, 2 }
  0x50   :  { %v222_v12 = vadd.f32 %v221_v11, %v220_v9 }
  0x52   :  { %v223_v14 = vrot.slane %v222_v12, 1 }
  0x54   :  { %v224_v16 = vadd.f32 %v223_v14, %v222_v12 }
  0x56   :  { %v228_v17 = vsel %vm227_vm3, %v224_v16, %v155_v13 }
  0x57   :  { %v230_v18 = vadd.f32 %v228_v17, %v21_v15 }
  0x59   :  { %232 = vst.msk [vmem:[#allocation2] sm:$0x3] %vm19_vm0, %v230_v18 }
  0x60   :  { %v236_v19 = vld [vmem:[#allocation2] sm:$0x3] }
  0x61   :  { %354 = vmatmul.mubr.msk.f32.vlgmr.msra.gmra.mxu0 %vm86_vm1, %v236_v19 }
 0x121   :  { %v310_v20 = vpop.f32.mrf.mxu0 }
 0x122   :  { %v314_v22 = vmul.f32 0.00390625, %v310_v20 }
 0x123   :  { %v355_v23 = vpop.f32.mrf.mxu0 }
 0x124   :  { %v322_v24 = vadd.f32 %v339_v21, %v314_v22 }
 0x126   :  { %323 = vst [vmem:[#allocation3] sm:$0x3] %v322_v24 }
 0x127   :  { %370 = shalt.err (!%p367_p4)
}
 0x128   :  { %333 = dma.vmem_to_hbm [thread:$0]  %s331_s12, 32, %s690_s3, [#allocation4]  }
 0x129   :  { %379 = dma.done.wait [#allocation4], 32  }
 0x12a   :  { %380 = vsyncadd [#allocation4], 4294967264 }
 0x12b   :  { %337 = vsyncpa [#allocation4], 1 }

</bundles_post_ra>
